<compile_context>
chip_gen: v5e
topology: v5e:2x2
jax: 0.10.0
libtpu: 0.0.40
codegen_flags: <defaults>
</compile_context>

<pallas_src>
import functools

import jax
import jax.numpy as jnp
from jax.experimental import pallas as pl
from jax.experimental.pallas import tpu as pltpu

LANE = 128
SUBLANE = 8


def _round_up(n, m):
    return ((n + m - 1) // m) * m


def _pad2(a, rows, cols):
    return jnp.pad(a, ((0, rows - a.shape[0]), (0, cols - a.shape[1])))


def _num_tensorcores_per_chip():
    """2 TensorCores on v7x, 1 on v5e/v6e.  Conservative fallback: 1."""
    try:
        kind = jax.devices()[0].device_kind.lower()
    except Exception:
        return 1
    if "v7" in kind or "7x" in kind:
        return 2
    return 1


# --------------------------------------------------------------------------
# Kernel: full 4-layer MLP on one batch tile.
# --------------------------------------------------------------------------
def _mlp_kernel(x_ref,
                w1_ref, b1_ref,
                w2_ref, b2_ref,
                w3_ref, b3_ref,
                w4_ref, b4_ref,
                o_ref):
    cdt = w1_ref.dtype                                      # MXU operand dtype

    x = x_ref[...].astype(cdt)                              # (tb, 42), cast in-kernel
    h = jnp.dot(x, w1_ref[...], preferred_element_type=jnp.float32)
    h = jnp.maximum(h + b1_ref[...], 0.0)                   # (tb, 128) f32

    h = jnp.dot(h.astype(cdt), w2_ref[...], preferred_element_type=jnp.float32)
    h = jnp.maximum(h + b2_ref[...], 0.0)

    h = jnp.dot(h.astype(cdt), w3_ref[...], preferred_element_type=jnp.float32)
    h = jnp.maximum(h + b3_ref[...], 0.0)

    h = jnp.dot(h.astype(cdt), w4_ref[...], preferred_element_type=jnp.float32)
    o_ref[...] = (h + b4_ref[...]).astype(o_ref.dtype)      # (tb, 8), no ReLU on last layer


# --------------------------------------------------------------------------
# One-time parameter preparation (pad + cast).  Do this once and reuse.
# --------------------------------------------------------------------------
def prepare_params(params, compute_dtype=jnp.bfloat16):
    (w1, b1), (w2, b2), (w3, b3), (w4, b4) = params
    D_in, D_hid = w1.shape
    D_out = w4.shape[1]

    H = _round_up(D_hid, LANE)        # 100 -> 128 (lane-dense hidden)
    N = _round_up(D_out, SUBLANE)     # 7   -> 8   (narrow output slab)

    w1_p = _pad2(w1, D_in, H).astype(compute_dtype)   # (42, 128): K stays 42
    w2_p = _pad2(w2, H, H).astype(compute_dtype)
    w3_p = _pad2(w3, H, H).astype(compute_dtype)
    w4_p = _pad2(w4, H, N).astype(compute_dtype)      # (128, 8)
    b1_p = _pad2(b1.reshape(1, -1), 1, H)             # biases stay f32
    b2_p = _pad2(b2.reshape(1, -1), 1, H)
    b3_p = _pad2(b3.reshape(1, -1), 1, H)
    b4_p = _pad2(b4.reshape(1, -1), 1, N)

    prepped = (w1_p, b1_p, w2_p, b2_p, w3_p, b3_p, w4_p, b4_p)
    return prepped, D_out


# --------------------------------------------------------------------------
# Forward pass.
# --------------------------------------------------------------------------
@functools.partial(jax.jit, static_argnames=("block_b", "num_tc", "d_out"))
def _mlp_forward_impl(x, prepped, block_b, num_tc, d_out):
    w1_p, b1_p, w2_p, b2_p, w3_p, b3_p, w4_p, b4_p = prepped
    B, D_in = x.shape
    N = w4_p.shape[1]

    # Batch tile: as big as fits (amortizes per-step overhead).  Only on
    # multi-TC chips (v7x) do we split so each core gets >= 2 grid steps,
    # which lets the BlockSpec pipeline hide the x-DMA / output writeback.
    B8 = _round_up(B, SUBLANE)
    tb = min(block_b, B8)
    if num_tc >= 2:
        target_steps = 2 * num_tc
        if B8 >= target_steps * SUBLANE:
            tb = min(tb, _round_up(pl.cdiv(B8, target_steps), SUBLANE))
    B_pad = _round_up(B8, tb)

    # Only batch padding (kept f32); feature cast/pad happens in the kernel.
    x_p = x if B_pad == B else jnp.pad(x, ((0, B_pad - B), (0, 0)))

    grid = (B_pad // tb,)

    def whole(arr):
        # Grid-invariant operand: same block every step -> resident in VMEM.
        return pl.BlockSpec(arr.shape, lambda i: (0,) * arr.ndim)

    out = pl.pallas_call(
        _mlp_kernel,
        out_shape=jax.ShapeDtypeStruct((B_pad, N), jnp.float32),
        grid_spec=pltpu.PrefetchScalarGridSpec(
            num_scalar_prefetch=0,
            grid=grid,
            in_specs=[
                pl.BlockSpec((tb, D_in), lambda i: (i, 0)),   # (tb, 42): last dim == full dim
                whole(w1_p), whole(b1_p),
                whole(w2_p), whole(b2_p),
                whole(w3_p), whole(b3_p),
                whole(w4_p), whole(b4_p),
            ],
            out_specs=pl.BlockSpec((tb, N), lambda i: (i, 0)),
        ),
        compiler_params=pltpu.CompilerParams(
            dimension_semantics=("parallel",)),
    )(x_p, w1_p, b1_p, w2_p, b2_p, w3_p, b3_p, w4_p, b4_p)

    return out[:B, :d_out]


def mlp_forward(x, prepped, d_out=7, block_b=2048, num_tc=None):
    """x: (B, 42) float32 -> (B, 7) float32, given prepare_params() output."""
    if num_tc is None:
        num_tc = _num_tensorcores_per_chip()
    return _mlp_forward_impl(x, prepped, block_b=block_b, num_tc=num_tc, d_out=d_out)


# --------------------------------------------------------------------------
# Deterministic init (mirrors torch.nn.Linear default) and plain-JAX reference.
# --------------------------------------------------------------------------
def init_params(key):
    dims = [(42, 100), (100, 100), (100, 100), (100, 7)]
    params = []
    for (fan_in, fan_out) in dims:
        key, kw, kb = jax.random.split(key, 3)
        bound = 1.0 / jnp.sqrt(jnp.float32(fan_in))
        w = jax.random.uniform(kw, (fan_in, fan_out), jnp.float32, -bound, bound)
        b = jax.random.uniform(kb, (fan_out,), jnp.float32, -bound, bound)
        params.append((w, b))
    return params


def mlp_reference(x, params):
    (w1, b1), (w2, b2), (w3, b3), (w4, b4) = params
    h = jnp.maximum(x @ w1 + b1, 0.0)
    h = jnp.maximum(h @ w2 + b2, 0.0)
    h = jnp.maximum(h @ w3 + b3, 0.0)
    return h @ w4 + b4


if __name__ == "__main__":
    key = jax.random.PRNGKey(0)
    key, kx, kp = jax.random.split(key, 3)

    B = 200                                   # not tile-aligned: exercises batch padding
    x = jax.random.normal(kx, (B, 42), jnp.float32)
    params = init_params(kp)
    ref = mlp_reference(x, params)

    # Exact-path validation (f32 MXU operands).
    prepped_f32, d_out = prepare_params(params, compute_dtype=jnp.float32)
    out_f32 = jax.block_until_ready(mlp_forward(x, prepped_f32, d_out=d_out))
    assert out_f32.shape == (B, 7)
    assert jnp.allclose(out_f32, ref, atol=1e-4, rtol=1e-4), "f32 kernel mismatch vs reference"

    # Fast path (bf16 MXU operands, f32 accumulation) — looser tolerance.
    prepped_bf16, _ = prepare_params(params, compute_dtype=jnp.bfloat16)
    out_bf16 = jax.block_until_ready(mlp_forward(x, prepped_bf16, d_out=d_out))
    assert out_bf16.shape == (B, 7)
    assert bool(jnp.all(jnp.isfinite(out_bf16)))
    assert jnp.allclose(out_bf16, ref, atol=1e-1, rtol=1e-1), "bf16 kernel mismatch vs reference"

    # TODO(synk): criterion / train_on_batch (loss + SGD update) not implemented;
    # only the forward pass is translated.
    print("KERNEL_OK")
</pallas_src>

<mosaic_0001>
module attributes {stable_mosaic.version = 11 : i64} {
  func.func @_mlp_kernel(%arg0: i32, %arg1: memref<200x42xf32, #tpu.memory_space<vmem>>, %arg2: memref<42x128xf32, #tpu.memory_space<vmem>>, %arg3: memref<1x128xf32, #tpu.memory_space<vmem>>, %arg4: memref<128x128xf32, #tpu.memory_space<vmem>>, %arg5: memref<1x128xf32, #tpu.memory_space<vmem>>, %arg6: memref<128x128xf32, #tpu.memory_space<vmem>>, %arg7: memref<1x128xf32, #tpu.memory_space<vmem>>, %arg8: memref<128x8xf32, #tpu.memory_space<vmem>>, %arg9: memref<1x8xf32, #tpu.memory_space<vmem>>, %arg10: memref<200x8xf32, #tpu.memory_space<vmem>>) attributes {dimension_semantics = [#tpu.dimension_semantics<parallel>], iteration_bounds = array<i64: 1>, scalar_prefetch = 0 : i64, scratch_operands = 0 : i64, tpu.core_type = #tpu.core_type<tc>, window_params = [{transform_indices = @transform_0, window_bounds = array<i64: 200, 42>}, {pipeline_mode = #tpu.pipeline_mode<synchronous>, transform_indices = @transform_1, window_bounds = array<i64: 42, 128>}, {pipeline_mode = #tpu.pipeline_mode<synchronous>, transform_indices = @transform_2, window_bounds = array<i64: 1, 128>}, {pipeline_mode = #tpu.pipeline_mode<synchronous>, transform_indices = @transform_3, window_bounds = array<i64: 128, 128>}, {pipeline_mode = #tpu.pipeline_mode<synchronous>, transform_indices = @transform_4, window_bounds = array<i64: 1, 128>}, {pipeline_mode = #tpu.pipeline_mode<synchronous>, transform_indices = @transform_5, window_bounds = array<i64: 128, 128>}, {pipeline_mode = #tpu.pipeline_mode<synchronous>, transform_indices = @transform_6, window_bounds = array<i64: 1, 128>}, {pipeline_mode = #tpu.pipeline_mode<synchronous>, transform_indices = @transform_7, window_bounds = array<i64: 128, 8>}, {pipeline_mode = #tpu.pipeline_mode<synchronous>, transform_indices = @transform_8, window_bounds = array<i64: 1, 8>}, {transform_indices = @transform_9, window_bounds = array<i64: 200, 8>}]} {
    %c0 = arith.constant 0 : index
    %c0_0 = arith.constant 0 : index
    %0 = vector.load %arg1[%c0, %c0_0] : memref<200x42xf32, #tpu.memory_space<vmem>>, vector<200x42xf32>
    %c0_1 = arith.constant 0 : index
    %c0_2 = arith.constant 0 : index
    %1 = vector.load %arg2[%c0_1, %c0_2] : memref<42x128xf32, #tpu.memory_space<vmem>>, vector<42x128xf32>
    %cst = arith.constant dense<0.000000e+00> : vector<200x128xf32>
    %2 = tpu.matmul %0, %1, %cst {dimension_numbers = #tpu.dot_dimension_numbers<[1], [0], [0], [1], [0, 0, 1, 1], [], []>} : vector<200x42xf32>, vector<42x128xf32>, vector<200x128xf32> -> vector<200x128xf32>
    %c0_3 = arith.constant 0 : index
    %c0_4 = arith.constant 0 : index
    %3 = vector.load %arg3[%c0_3, %c0_4] : memref<1x128xf32, #tpu.memory_space<vmem>>, vector<1x128xf32>
    %4 = vector.broadcast %3 : vector<1x128xf32> to vector<200x128xf32>
    %5 = arith.addf %2, %4 : vector<200x128xf32>
    %cst_5 = arith.constant 0.000000e+00 : f32
    %6 = vector.broadcast %cst_5 : f32 to vector<200x128xf32>
    %7 = arith.maximumf %5, %6 : vector<200x128xf32>
    %c0_6 = arith.constant 0 : index
    %c0_7 = arith.constant 0 : index
    %8 = vector.load %arg4[%c0_6, %c0_7] : memref<128x128xf32, #tpu.memory_space<vmem>>, vector<128x128xf32>
    %cst_8 = arith.constant dense<0.000000e+00> : vector<200x128xf32>
    %9 = tpu.matmul %7, %8, %cst_8 {dimension_numbers = #tpu.dot_dimension_numbers<[1], [0], [0], [1], [0, 0, 1, 1], [], []>} : vector<200x128xf32>, vector<128x128xf32>, vector<200x128xf32> -> vector<200x128xf32>
    %c0_9 = arith.constant 0 : index
    %c0_10 = arith.constant 0 : index
    %10 = vector.load %arg5[%c0_9, %c0_10] : memref<1x128xf32, #tpu.memory_space<vmem>>, vector<1x128xf32>
    %11 = vector.broadcast %10 : vector<1x128xf32> to vector<200x128xf32>
    %12 = arith.addf %9, %11 : vector<200x128xf32>
    %cst_11 = arith.constant 0.000000e+00 : f32
    %13 = vector.broadcast %cst_11 : f32 to vector<200x128xf32>
    %14 = arith.maximumf %12, %13 : vector<200x128xf32>
    %c0_12 = arith.constant 0 : index
    %c0_13 = arith.constant 0 : index
    %15 = vector.load %arg6[%c0_12, %c0_13] : memref<128x128xf32, #tpu.memory_space<vmem>>, vector<128x128xf32>
    %cst_14 = arith.constant dense<0.000000e+00> : vector<200x128xf32>
    %16 = tpu.matmul %14, %15, %cst_14 {dimension_numbers = #tpu.dot_dimension_numbers<[1], [0], [0], [1], [0, 0, 1, 1], [], []>} : vector<200x128xf32>, vector<128x128xf32>, vector<200x128xf32> -> vector<200x128xf32>
    %c0_15 = arith.constant 0 : index
    %c0_16 = arith.constant 0 : index
    %17 = vector.load %arg7[%c0_15, %c0_16] : memref<1x128xf32, #tpu.memory_space<vmem>>, vector<1x128xf32>
    %18 = vector.broadcast %17 : vector<1x128xf32> to vector<200x128xf32>
    %19 = arith.addf %16, %18 : vector<200x128xf32>
    %cst_17 = arith.constant 0.000000e+00 : f32
    %20 = vector.broadcast %cst_17 : f32 to vector<200x128xf32>
    %21 = arith.maximumf %19, %20 : vector<200x128xf32>
    %c0_18 = arith.constant 0 : index
    %c0_19 = arith.constant 0 : index
    %22 = vector.load %arg8[%c0_18, %c0_19] : memref<128x8xf32, #tpu.memory_space<vmem>>, vector<128x8xf32>
    %cst_20 = arith.constant dense<0.000000e+00> : vector<200x8xf32>
    %23 = tpu.matmul %21, %22, %cst_20 {dimension_numbers = #tpu.dot_dimension_numbers<[1], [0], [0], [1], [0, 0, 1, 1], [], []>} : vector<200x128xf32>, vector<128x8xf32>, vector<200x8xf32> -> vector<200x8xf32>
    %c0_21 = arith.constant 0 : index
    %c0_22 = arith.constant 0 : index
    %24 = vector.load %arg9[%c0_21, %c0_22] : memref<1x8xf32, #tpu.memory_space<vmem>>, vector<1x8xf32>
    %25 = vector.broadcast %24 : vector<1x8xf32> to vector<200x8xf32>
    %26 = arith.addf %23, %25 : vector<200x8xf32>
    %c0_23 = arith.constant 0 : index
    %c0_24 = arith.constant 0 : index
    %27 = vector.load %arg10[%c0_23, %c0_24] : memref<200x8xf32, #tpu.memory_space<vmem>>, vector<200x8xf32>
    tpu.vector_store %arg10[%c0_23, %c0_24], %26 {strides = array<i32>} : memref<200x8xf32, #tpu.memory_space<vmem>>, vector<200x8xf32>,
    return
  }
  func.func @transform_0(%arg0: i32) -> (i32, i32) {
    %c0_i32 = arith.constant 0 : i32
    %c0_i32_0 = arith.constant 0 : i32
    return %arg0, %c0_i32 : i32, i32
  }
  func.func @transform_1(%arg0: i32) -> (i32, i32) {
    %c0_i32 = arith.constant 0 : i32
    %c0_i32_0 = arith.constant 0 : i32
    %c0_i32_1 = arith.constant 0 : i32
    return %c0_i32, %c0_i32_0 : i32, i32
  }
  func.func @transform_2(%arg0: i32) -> (i32, i32) {
    %c0_i32 = arith.constant 0 : i32
    %c0_i32_0 = arith.constant 0 : i32
    %c0_i32_1 = arith.constant 0 : i32
    return %c0_i32, %c0_i32_0 : i32, i32
  }
  func.func @transform_3(%arg0: i32) -> (i32, i32) {
    %c0_i32 = arith.constant 0 : i32
    %c0_i32_0 = arith.constant 0 : i32
    %c0_i32_1 = arith.constant 0 : i32
    return %c0_i32, %c0_i32_0 : i32, i32
  }
  func.func @transform_4(%arg0: i32) -> (i32, i32) {
    %c0_i32 = arith.constant 0 : i32
    %c0_i32_0 = arith.constant 0 : i32
    %c0_i32_1 = arith.constant 0 : i32
    return %c0_i32, %c0_i32_0 : i32, i32
  }
  func.func @transform_5(%arg0: i32) -> (i32, i32) {
    %c0_i32 = arith.constant 0 : i32
    %c0_i32_0 = arith.constant 0 : i32
    %c0_i32_1 = arith.constant 0 : i32
    return %c0_i32, %c0_i32_0 : i32, i32
  }
  func.func @transform_6(%arg0: i32) -> (i32, i32) {
    %c0_i32 = arith.constant 0 : i32
    %c0_i32_0 = arith.constant 0 : i32
    %c0_i32_1 = arith.constant 0 : i32
    return %c0_i32, %c0_i32_0 : i32, i32
  }
  func.func @transform_7(%arg0: i32) -> (i32, i32) {
    %c0_i32 = arith.constant 0 : i32
    %c0_i32_0 = arith.constant 0 : i32
    %c0_i32_1 = arith.constant 0 : i32
    return %c0_i32, %c0_i32_0 : i32, i32
  }
  func.func @transform_8(%arg0: i32) -> (i32, i32) {
    %c0_i32 = arith.constant 0 : i32
    %c0_i32_0 = arith.constant 0 : i32
    %c0_i32_1 = arith.constant 0 : i32
    return %c0_i32, %c0_i32_0 : i32, i32
  }
  func.func @transform_9(%arg0: i32) -> (i32, i32) {
    %c0_i32 = arith.constant 0 : i32
    %c0_i32_0 = arith.constant 0 : i32
    return %arg0, %c0_i32 : i32, i32
  }
}

</mosaic_0001>

<bundles_post_ra>
// kernel: _mlp_forward_impl.1
= control target key start
LH: loop header
LB: loop body
LE: loop exit
PB: predicated region body
PF: predicated region fallthrough
CT: control target
= control target key end

     0   :  { %vm143_vm0 = vcmask 1041408   ;;  %vm67_vm1 = vcmask 343040   ;;  %vm650_vm2 = vcmask 64512   ;;  %s1242_s1 = inlined_call_operand.vmem [shape: f32[42,128], index: 1, kind: input, shape index: {}]   ;;  %s1243_s2 = inlined_call_operand.vmem [shape: f32[1,128], index: 2, kind: input, shape index: {}]   ;;  %s1244_s0 = inlined_call_operand.vmem [shape: f32[200,42], index: 0, kind: input, shape index: {}]   ;;  %s1245_s3 = inlined_call_operand.vmem [shape: f32[128,128], index: 3, kind: input, shape index: {}]   ;;  %s1246_s4 = inlined_call_operand.vmem [shape: f32[1,128], index: 4, kind: input, shape index: {}]   ;;  %s1247_s5 = inlined_call_operand.vmem [shape: f32[128,128], index: 5, kind: input, shape index: {}]   ;;  %s1248_s6 = inlined_call_operand.vmem [shape: f32[1,128], index: 6, kind: input, shape index: {}]   ;;  %s1249_s7 = inlined_call_operand.vmem [shape: f32[128,8], index: 7, kind: input, shape index: {}]   ;;  %s1250_s8 = inlined_call_operand.vmem [shape: f32[1,8], index: 8, kind: input, shape index: {}]   ;;  %s1251_s9 = inlined_call_operand.vmem [shape: f32[200,8], index: 9, kind: output, shape index: {}]  }
   0x1   :  { %v62_v0 = vld [vmem:[%s1242_s1 + $0x28] sm:$0x3]  ;;  %v61_v1 = vld [vmem:[%s1242_s1 + $0x20] sm:$0xff]  ;;  %v60_v2 = vld [vmem:[%s1242_s1 + $0x18] sm:$0xff] }
   0x2   :  { %680 = vmatpush.msk.msra.mxu0 %vm143_vm0, %v62_v0  ;;  %v59_v3 = vld [vmem:[%s1242_s1 + $0x10] sm:$0xff]  ;;  %v58_v4 = vld [vmem:[%s1242_s1 + $0x8] sm:$0xff]  ;;  %v57_v5 = vld [vmem:[%s1242_s1] sm:$0xff] }
   0x3   :  { %v32_v6 = vld [vmem:[%s1244_s0] sm:$0xff]  ;;  %v33_v7 = vld [vmem:[%s1244_s0 + $0x8] sm:$0xff]  ;;  %v34_v8 = vld [vmem:[%s1244_s0 + $0x10] sm:$0xff] }
   0x4   :  { %158 = vmatpush.msra.mxu0 %v61_v1  ;;  %v35_v9 = vld [vmem:[%s1244_s0 + $0x18] sm:$0xff]  ;;  %v36_v10 = vld [vmem:[%s1244_s0 + $0x20] sm:$0xff]  ;;  %v37_v11 = vld [vmem:[%s1244_s0 + $0x28] sm:$0xff] }
   0x5   :  { %v38_v12 = vld [vmem:[%s1244_s0 + $0x30] sm:$0xff]  ;;  %v39_v13 = vld [vmem:[%s1244_s0 + $0x38] sm:$0xff]  ;;  %v40_v14 = vld [vmem:[%s1244_s0 + $0x40] sm:$0xff] }
   0x6   :  { %159 = vmatpush.msra.mxu0 %v60_v2  ;;  %v279_v15 = vld [vmem:[%s1245_s3 + $0x78] sm:$0xff]  ;;  %v278_v16 = vld [vmem:[%s1245_s3 + $0x70] sm:$0xff]  ;;  %v277_v17 = vld [vmem:[%s1245_s3 + $0x68] sm:$0xff] }
   0x7   :  { %284 = vmatpush.msra.mxu1 %v279_v15  ;;  %v41_v18 = vld [vmem:[%s1244_s0 + $0x48] sm:$0xff]  ;;  %v276_v19 = vld [vmem:[%s1245_s3 + $0x60] sm:$0xff]  ;;  %v275_v20 = vld [vmem:[%s1245_s3 + $0x58] sm:$0xff] }
   0x8   :  { %160 = vmatpush.msra.mxu0 %v59_v3  ;;  %v274_v21 = vld [vmem:[%s1245_s3 + $0x50] sm:$0xff]  ;;  %v273_v22 = vld [vmem:[%s1245_s3 + $0x48] sm:$0xff]  ;;  %v272_v24 = vld [vmem:[%s1245_s3 + $0x40] sm:$0xff] }
   0x9   :  { %285 = vmatpush.msra.mxu1 %v278_v16  ;;  %v42_v23 = vld [vmem:[%s1244_s0 + $0x50] sm:$0xff]  ;;  %v271_v25 = vld [vmem:[%s1245_s3 + $0x38] sm:$0xff]  ;;  %v269_v27 = vld [vmem:[%s1245_s3 + $0x28] sm:$0xff] }
   0xa   :  { %161 = vmatpush.msra.mxu0 %v58_v4  ;;  %v270_v26 = vld [vmem:[%s1245_s3 + $0x30] sm:$0xff]  ;;  %v43_v28 = vld [vmem:[%s1244_s0 + $0x58] sm:$0xff]  ;;  %v268_v29 = vld [vmem:[%s1245_s3 + $0x20] sm:$0xff] }
   0xb   :  { %286 = vmatpush.msra.mxu1 %v277_v17  ;;  %v267_v30 = vld [vmem:[%s1245_s3 + $0x18] sm:$0xff]  ;;  %v266_v31 = vld [vmem:[%s1245_s3 + $0x10] sm:$0xff]  ;;  %v44_v32 = vld [vmem:[%s1244_s0 + $0x60] sm:$0xff] }
   0xc   :  { %162 = vmatpush.msra.mxu0 %v57_v5  ;;  %v265_v33 = vld [vmem:[%s1245_s3 + $0x8] sm:$0xff]  ;;  %v264_v34 = vld [vmem:[%s1245_s3] sm:$0xff]  ;;  %v46_v36 = vld [vmem:[%s1244_s0 + $0x70] sm:$0xff] }
   0xd   :  { %681 = vmatmul.msk.f32.vlgmr.msra.gmra.mxu0 %vm67_vm1, %v32_v6  ;;  %287 = vmatpush.msra.mxu1 %v276_v19  ;;  %v45_v35 = vld [vmem:[%s1244_s0 + $0x68] sm:$0xff]  ;;  %v47_v37 = vld [vmem:[%s1244_s0 + $0x78] sm:$0xff]  ;;  %v893_v38 = vld [vmem:[%s1243_s2] ss:$0 sm:$0xff] }
   0xe   :  { %v48_v40 = vld [vmem:[%s1244_s0 + $0x80] sm:$0xff]  ;;  %v49_v44 = vld [vmem:[%s1244_s0 + $0x88] sm:$0xff]  ;;  %v50_v48 = vld [vmem:[%s1244_s0 + $0x90] sm:$0xff] }
   0xf   :  { %288 = vmatpush.msra.mxu1 %v275_v20  ;;  %v51_v52 = vld [vmem:[%s1244_s0 + $0x98] sm:$0xff]  ;;  %v52_v56 = vld [vmem:[%s1244_s0 + $0xa0] sm:$0xff]  ;;  %v53_v60 = vld [vmem:[%s1244_s0 + $0xa8] sm:$0xff] }
  0x10   :  { %v54_v0 = vld [vmem:[%s1244_s0 + $0xb0] sm:$0xff]  ;;  %v55_v4 = vld [vmem:[%s1244_s0 + $0xb8] sm:$0xff]  ;;  %v414_v16 = vld [vmem:[%s1247_s5 + $0x68] sm:$0xff] }
  0x11   :  { %289 = vmatpush.msra.mxu1 %v274_v21  ;;  %v413_v17 = vld [vmem:[%s1247_s5 + $0x60] sm:$0xff]  ;;  %v411_v21 = vld [vmem:[%s1247_s5 + $0x50] sm:$0xff] }
  0x13   :  { %290 = vmatpush.msra.mxu1 %v273_v22 }
  0x15   :  { %682 = vmatmul.msk.f32.gmra.mxu0 %vm67_vm1, %v33_v7  ;;  %291 = vmatpush.msra.mxu1 %v272_v24  ;;  %v409_v24 = vld [vmem:[%s1247_s5 + $0x40] sm:$0xff] }
  0x17   :  { %292 = vmatpush.msra.mxu1 %v271_v25  ;;  %v408_v25 = vld [vmem:[%s1247_s5 + $0x38] sm:$0xff] }
  0x19   :  { %293 = vmatpush.msra.mxu1 %v270_v26 }
  0x1b   :  { %294 = vmatpush.msra.mxu1 %v269_v27 }
  0x1d   :  { %683 = vmatmul.msk.f32.gmra.mxu0 %vm67_vm1, %v34_v8  ;;  %295 = vmatpush.msra.mxu1 %v268_v29  ;;  %v56_v8 = vld [vmem:[%s1244_s0 + $0xc0] sm:$0xff] }
  0x1f   :  { %296 = vmatpush.msra.mxu1 %v267_v30  ;;  %v406_v30 = vld [vmem:[%s1247_s5 + $0x28] sm:$0xff] }
  0x21   :  { %297 = vmatpush.msra.mxu1 %v266_v31  ;;  %v405_v31 = vld [vmem:[%s1247_s5 + $0x20] sm:$0xff] }
  0x23   :  { %298 = vmatpush.msra.mxu1 %v265_v33 }
  0x25   :  { %684 = vmatmul.msk.f32.gmra.mxu0 %vm67_vm1, %v35_v9  ;;  %299 = vmatpush.msra.mxu1 %v264_v34 }
  0x2d   :  { %685 = vmatmul.msk.f32.gmra.mxu0 %vm67_vm1, %v36_v10 }
  0x35   :  { %686 = vmatmul.msk.f32.gmra.mxu0 %vm67_vm1, %v37_v11  ;;  %v416_v11 = vld [vmem:[%s1247_s5 + $0x78] sm:$0xff] }
  0x36   :  { %421 = vmatpush.msra.mxu2 %v416_v11 }
  0x3d   :  { %687 = vmatmul.msk.f32.gmra.mxu0 %vm67_vm1, %v38_v12 }
  0x45   :  { %688 = vmatmul.msk.f32.gmra.mxu0 %vm67_vm1, %v39_v13 }
  0x4d   :  { %689 = vmatmul.msk.f32.gmra.mxu0 %vm67_vm1, %v40_v14  ;;  %v415_v14 = vld [vmem:[%s1247_s5 + $0x70] sm:$0xff] }
  0x4e   :  { %422 = vmatpush.msra.mxu2 %v415_v14 }
  0x50   :  { %423 = vmatpush.msra.mxu2 %v414_v16 }
  0x52   :  { %424 = vmatpush.msra.mxu2 %v413_v17 }
  0x55   :  { %690 = vmatmul.msk.f32.gmra.mxu0 %vm67_vm1, %v41_v18  ;;  %v412_v18 = vld [vmem:[%s1247_s5 + $0x58] sm:$0xff] }
  0x56   :  { %425 = vmatpush.msra.mxu2 %v412_v18 }
  0x58   :  { %426 = vmatpush.msra.mxu2 %v411_v21 }
  0x5d   :  { %691 = vmatmul.msk.f32.gmra.mxu0 %vm67_vm1, %v42_v23  ;;  %v410_v23 = vld [vmem:[%s1247_s5 + $0x48] sm:$0xff] }
  0x5e   :  { %427 = vmatpush.msra.mxu2 %v410_v23 }
  0x60   :  { %428 = vmatpush.msra.mxu2 %v409_v24 }
  0x62   :  { %429 = vmatpush.msra.mxu2 %v408_v25 }
  0x65   :  { %692 = vmatmul.msk.f32.gmra.mxu0 %vm67_vm1, %v43_v28  ;;  %v407_v28 = vld [vmem:[%s1247_s5 + $0x30] sm:$0xff] }
  0x66   :  { %430 = vmatpush.msra.mxu2 %v407_v28 }
  0x68   :  { %431 = vmatpush.msra.mxu2 %v406_v30 }
  0x6a   :  { %432 = vmatpush.msra.mxu2 %v405_v31 }
  0x6d   :  { %693 = vmatmul.msk.f32.gmra.mxu0 %vm67_vm1, %v44_v32  ;;  %v404_v32 = vld [vmem:[%s1247_s5 + $0x18] sm:$0xff] }
  0x6e   :  { %433 = vmatpush.msra.mxu2 %v404_v32 }
  0x75   :  { %694 = vmatmul.msk.f32.gmra.mxu0 %vm67_vm1, %v45_v35  ;;  %v403_v35 = vld [vmem:[%s1247_s5 + $0x10] sm:$0xff] }
  0x76   :  { %434 = vmatpush.msra.mxu2 %v403_v35 }
  0x7d   :  { %695 = vmatmul.msk.f32.gmra.mxu0 %vm67_vm1, %v46_v36 }
  0x85   :  { %696 = vmatmul.msk.f32.gmra.mxu0 %vm67_vm1, %v47_v37  ;;  %v402_v37 = vld [vmem:[%s1247_s5 + $0x8] sm:$0xff] }
  0x86   :  { %435 = vmatpush.msra.mxu2 %v402_v37 }
  0x8a   :  { %v164_v39 = vpop.f32.mrf.mxu0 }
  0x8b   :  { %v165_v41 = vadd.f32 %v893_v38, %v164_v39  ;;  %v401_v39 = vld [vmem:[%s1247_s5] sm:$0xff] }
  0x8c   :  { %436 = vmatpush.msra.mxu2 %v401_v39 }
  0x8d   :  { %697 = vmatmul.msk.f32.gmra.mxu0 %vm67_vm1, %v48_v40  ;;  %v239_v42 = vmax.f32 %v165_v41, 0.0 }
  0x8f   :  { %300 = vmatmul.f32.vlgmr.msra.gmra.mxu1 %v239_v42 }
  0x92   :  { %v167_v43 = vpop.f32.mrf.mxu0 }
  0x93   :  { %v168_v45 = vadd.f32 %v893_v38, %v167_v43 }
  0x95   :  { %v240_v46 = vmax.f32 %v168_v45, 0.0  ;;  %698 = vmatmul.msk.f32.gmra.mxu0 %vm67_vm1, %v49_v44 }
  0x97   :  { %303 = vmatmul.f32.gmra.mxu1 %v240_v46 }
  0x9a   :  { %v170_v47 = vpop.f32.mrf.mxu0 }
  0x9b   :  { %v171_v49 = vadd.f32 %v893_v38, %v170_v47 }
  0x9d   :  { %v241_v50 = vmax.f32 %v171_v49, 0.0  ;;  %699 = vmatmul.msk.f32.gmra.mxu0 %vm67_vm1, %v50_v48  ;;  %v998_v49 = vld [vmem:[%s1246_s4] ss:$0 sm:$0xff] }
  0x9f   :  { %306 = vmatmul.f32.gmra.mxu1 %v241_v50 }
  0xa2   :  { %v173_v51 = vpop.f32.mrf.mxu0 }
  0xa3   :  { %v174_v53 = vadd.f32 %v893_v38, %v173_v51 }
  0xa5   :  { %v242_v54 = vmax.f32 %v174_v53, 0.0  ;;  %700 = vmatmul.msk.f32.gmra.mxu0 %vm67_vm1, %v51_v52 }
  0xa7   :  { %309 = vmatmul.f32.gmra.mxu1 %v242_v54 }
  0xaa   :  { %v176_v55 = vpop.f32.mrf.mxu0 }
  0xab   :  { %v177_v57 = vadd.f32 %v893_v38, %v176_v55 }
  0xad   :  { %v243_v58 = vmax.f32 %v177_v57, 0.0  ;;  %701 = vmatmul.msk.f32.gmra.mxu0 %vm67_vm1, %v52_v56 }
  0xaf   :  { %312 = vmatmul.f32.gmra.mxu1 %v243_v58 }
  0xb2   :  { %v179_v59 = vpop.f32.mrf.mxu0 }
  0xb3   :  { %v180_v61 = vadd.f32 %v893_v38, %v179_v59 }
  0xb5   :  { %v244_v62 = vmax.f32 %v180_v61, 0.0  ;;  %702 = vmatmul.msk.f32.gmra.mxu0 %vm67_vm1, %v53_v60 }
  0xb7   :  { %315 = vmatmul.f32.gmra.mxu1 %v244_v62 }
  0xba   :  { %v182_v63 = vpop.f32.mrf.mxu0 }
  0xbb   :  { %v183_v1 = vadd.f32 %v893_v38, %v182_v63 }
  0xbd   :  { %v245_v2 = vmax.f32 %v183_v1, 0.0  ;;  %703 = vmatmul.msk.f32.gmra.mxu0 %vm67_vm1, %v54_v0 }
  0xbf   :  { %318 = vmatmul.f32.gmra.mxu1 %v245_v2 }
  0xc2   :  { %v185_v3 = vpop.f32.mrf.mxu0 }
  0xc3   :  { %v186_v5 = vadd.f32 %v893_v38, %v185_v3 }
  0xc5   :  { %v246_v6 = vmax.f32 %v186_v5, 0.0  ;;  %704 = vmatmul.msk.f32.gmra.mxu0 %vm67_vm1, %v55_v4 }
  0xc7   :  { %321 = vmatmul.f32.gmra.mxu1 %v246_v6 }
  0xca   :  { %v188_v7 = vpop.f32.mrf.mxu0 }
  0xcb   :  { %v189_v9 = vadd.f32 %v893_v38, %v188_v7 }
  0xcd   :  { %v247_v10 = vmax.f32 %v189_v9, 0.0  ;;  %705 = vmatmul.msk.f32.gmra.mxu0 %vm67_vm1, %v56_v8 }
  0xcf   :  { %324 = vmatmul.f32.gmra.mxu1 %v247_v10 }
  0xd2   :  { %v191_v12 = vpop.f32.mrf.mxu0 }
  0xd3   :  { %v192_v13 = vadd.f32 %v893_v38, %v191_v12 }
  0xd5   :  { %v248_v15 = vmax.f32 %v192_v13, 0.0 }
  0xd7   :  { %327 = vmatmul.f32.gmra.mxu1 %v248_v15 }
  0xda   :  { %v194_v19 = vpop.f32.mrf.mxu0 }
  0xdb   :  { %v195_v20 = vadd.f32 %v893_v38, %v194_v19 }
  0xdd   :  { %v249_v22 = vmax.f32 %v195_v20, 0.0 }
  0xdf   :  { %330 = vmatmul.f32.gmra.mxu1 %v249_v22 }
  0xe2   :  { %v197_v26 = vpop.f32.mrf.mxu0 }
  0xe3   :  { %v198_v27 = vadd.f32 %v893_v38, %v197_v26 }
  0xe5   :  { %v250_v29 = vmax.f32 %v198_v27, 0.0 }
  0xe7   :  { %333 = vmatmul.f32.gmra.mxu1 %v250_v29 }
  0xea   :  { %v200_v33 = vpop.f32.mrf.mxu0 }
  0xeb   :  { %v201_v34 = vadd.f32 %v893_v38, %v200_v33 }
  0xed   :  { %v251_v36 = vmax.f32 %v201_v34, 0.0 }
  0xef   :  { %336 = vmatmul.f32.gmra.mxu1 %v251_v36 }
  0xf2   :  { %v203_v40 = vpop.f32.mrf.mxu0 }
  0xf3   :  { %v204_v41 = vadd.f32 %v893_v38, %v203_v40 }
  0xf5   :  { %v252_v42 = vmax.f32 %v204_v41, 0.0 }
  0xf7   :  { %339 = vmatmul.f32.gmra.mxu1 %v252_v42 }
  0xfa   :  { %v206_v43 = vpop.f32.mrf.mxu0 }
  0xfb   :  { %v207_v44 = vadd.f32 %v893_v38, %v206_v43 }
  0xfd   :  { %v253_v45 = vmax.f32 %v207_v44, 0.0  ;;  %v553_v44 = vld [vmem:[%s1249_s7 + $0x78] sm:$0xff] }
  0xfe   :  { %558 = vmatpush.msra.mxu3 %v553_v44 }
  0xff   :  { %342 = vmatmul.f32.gmra.mxu1 %v253_v45 }
 0x102   :  { %v209_v46 = vpop.f32.mrf.mxu0 }
 0x103   :  { %v210_v47 = vadd.f32 %v893_v38, %v209_v46 }
 0x105   :  { %v254_v48 = vmax.f32 %v210_v47, 0.0  ;;  %v551_v47 = vld [vmem:[%s1249_s7 + $0x68] sm:$0xff] }
 0x107   :  { %345 = vmatmul.f32.gmra.mxu1 %v254_v48 }
 0x10a   :  { %v212_v50 = vpop.f32.mrf.mxu0 }
 0x10b   :  { %v213_v51 = vadd.f32 %v893_v38, %v212_v50  ;;  %v550_v50 = vld [vmem:[%s1249_s7 + $0x60] sm:$0xff] }
 0x10c   :  { %v301_v52 = vpop.f32.mrf.mxu1 }
 0x10d   :  { %v255_v53 = vmax.f32 %v213_v51, 0.0  ;;  %v302_v54 = vadd.f32 %v998_v49, %v301_v52  ;;  %v549_v51 = vld [vmem:[%s1249_s7 + $0x58] sm:$0xff]  ;;  %v548_v52 = vld [vmem:[%s1249_s7 + $0x50] sm:$0xff] }
 0x10f   :  { %348 = vmatmul.f32.gmra.mxu1 %v255_v53  ;;  %v376_v55 = vmax.f32 %v302_v54, 0.0 }
 0x111   :  { %437 = vmatmul.f32.vlgmr.msra.gmra.mxu2 %v376_v55  ;;  %v547_v55 = vld [vmem:[%s1249_s7 + $0x48] sm:$0xff] }
 0x112   :  { %v215_v56 = vpop.f32.mrf.mxu0 }
 0x113   :  { %v216_v57 = vadd.f32 %v893_v38, %v215_v56 }
 0x114   :  { %v304_v58 = vpop.f32.mrf.mxu1 }
 0x115   :  { %v256_v59 = vmax.f32 %v216_v57, 0.0  ;;  %v305_v60 = vadd.f32 %v998_v49, %v304_v58  ;;  %v546_v57 = vld [vmem:[%s1249_s7 + $0x40] sm:$0xff]  ;;  %v545_v58 = vld [vmem:[%s1249_s7 + $0x38] sm:$0xff] }
 0x117   :  { %v377_v61 = vmax.f32 %v305_v60, 0.0  ;;  %351 = vmatmul.f32.gmra.mxu1 %v256_v59  ;;  %v544_v59 = vld [vmem:[%s1249_s7 + $0x30] sm:$0xff] }
 0x119   :  { %440 = vmatmul.f32.gmra.mxu2 %v377_v61 }
 0x11a   :  { %v218_v62 = vpop.f32.mrf.mxu0 }
 0x11b   :  { %v219_v63 = vadd.f32 %v893_v38, %v218_v62  ;;  %v543_v62 = vld [vmem:[%s1249_s7 + $0x28] sm:$0xff] }
 0x11c   :  { %v307_v0 = vpop.f32.mrf.mxu1 }
 0x11d   :  { %v257_v1 = vmax.f32 %v219_v63, 0.0  ;;  %v308_v2 = vadd.f32 %v998_v49, %v307_v0  ;;  %v542_v0 = vld [vmem:[%s1249_s7 + $0x20] sm:$0xff] }
 0x11f   :  { %v378_v3 = vmax.f32 %v308_v2, 0.0  ;;  %354 = vmatmul.f32.gmra.mxu1 %v257_v1  ;;  %v541_v1 = vld [vmem:[%s1249_s7 + $0x18] sm:$0xff]  ;;  %v540_v2 = vld [vmem:[%s1249_s7 + $0x10] sm:$0xff] }
 0x121   :  { %443 = vmatmul.f32.gmra.mxu2 %v378_v3 }
 0x122   :  { %v221_v4 = vpop.f32.mrf.mxu0 }
 0x123   :  { %v222_v5 = vadd.f32 %v893_v38, %v221_v4 }
 0x124   :  { %v310_v6 = vpop.f32.mrf.mxu1 }
 0x125   :  { %v258_v7 = vmax.f32 %v222_v5, 0.0  ;;  %v311_v8 = vadd.f32 %v998_v49, %v310_v6  ;;  %v539_v5 = vld [vmem:[%s1249_s7 + $0x8] sm:$0xff] }
 0x127   :  { %v379_v9 = vmax.f32 %v311_v8, 0.0  ;;  %357 = vmatmul.f32.gmra.mxu1 %v258_v7  ;;  %v538_v7 = vld [vmem:[%s1249_s7] sm:$0xff] }
 0x129   :  { %446 = vmatmul.f32.gmra.mxu2 %v379_v9 }
 0x12a   :  { %v224_v10 = vpop.f32.mrf.mxu0 }
 0x12b   :  { %v225_v11 = vadd.f32 %v893_v38, %v224_v10 }
 0x12c   :  { %v313_v12 = vpop.f32.mrf.mxu1 }
 0x12d   :  { %v259_v13 = vmax.f32 %v225_v11, 0.0  ;;  %v314_v14 = vadd.f32 %v998_v49, %v313_v12 }
 0x12f   :  { %v380_v15 = vmax.f32 %v314_v14, 0.0  ;;  %360 = vmatmul.f32.gmra.mxu1 %v259_v13 }
 0x131   :  { %449 = vmatmul.f32.gmra.mxu2 %v380_v15 }
 0x132   :  { %v227_v16 = vpop.f32.mrf.mxu0 }
 0x133   :  { %v228_v17 = vadd.f32 %v893_v38, %v227_v16 }
 0x134   :  { %v316_v18 = vpop.f32.mrf.mxu1 }
 0x135   :  { %v260_v19 = vmax.f32 %v228_v17, 0.0  ;;  %v317_v20 = vadd.f32 %v998_v49, %v316_v18  ;;  %v1077_v17 = vld [vmem:[%s1248_s6] ss:$0 sm:$0xff] }
 0x137   :  { %v381_v21 = vmax.f32 %v317_v20, 0.0  ;;  %363 = vmatmul.f32.gmra.mxu1 %v260_v19 }
 0x139   :  { %452 = vmatmul.f32.gmra.mxu2 %v381_v21 }
 0x13a   :  { %v230_v22 = vpop.f32.mrf.mxu0 }
 0x13b   :  { %v231_v23 = vadd.f32 %v893_v38, %v230_v22 }
 0x13c   :  { %v319_v24 = vpop.f32.mrf.mxu1 }
 0x13d   :  { %v261_v25 = vmax.f32 %v231_v23, 0.0  ;;  %v320_v26 = vadd.f32 %v998_v49, %v319_v24 }
 0x13f   :  { %v382_v27 = vmax.f32 %v320_v26, 0.0  ;;  %366 = vmatmul.f32.gmra.mxu1 %v261_v25 }
 0x141   :  { %455 = vmatmul.f32.gmra.mxu2 %v382_v27 }
 0x142   :  { %v233_v28 = vpop.f32.mrf.mxu0 }
 0x143   :  { %v234_v29 = vadd.f32 %v893_v38, %v233_v28 }
 0x144   :  { %v322_v30 = vpop.f32.mrf.mxu1 }
 0x145   :  { %v262_v31 = vmax.f32 %v234_v29, 0.0  ;;  %v323_v32 = vadd.f32 %v998_v49, %v322_v30 }
 0x147   :  { %v383_v33 = vmax.f32 %v323_v32, 0.0  ;;  %369 = vmatmul.f32.gmra.mxu1 %v262_v31 }
 0x149   :  { %458 = vmatmul.f32.gmra.mxu2 %v383_v33 }
 0x14a   :  { %v236_v34 = vpop.f32.mrf.mxu0 }
 0x14b   :  { %v237_v35 = vadd.f32 %v893_v38, %v236_v34  ;;  %v552_v38 = vld [vmem:[%s1249_s7 + $0x70] sm:$0xff] }
 0x14c   :  { %v325_v36 = vpop.f32.mrf.mxu1  ;;  %559 = vmatpush.msra.mxu3 %v552_v38 }
 0x14d   :  { %v263_v37 = vmax.f32 %v237_v35, 0.0  ;;  %v326_v39 = vadd.f32 %v998_v49, %v325_v36 }
 0x14e   :  { %560 = vmatpush.msra.mxu3 %v551_v47 }
 0x14f   :  { %v384_v40 = vmax.f32 %v326_v39, 0.0  ;;  %372 = vmatmul.f32.gmra.mxu1 %v263_v37 }
 0x150   :  { %561 = vmatpush.msra.mxu3 %v550_v50 }
 0x151   :  { %461 = vmatmul.f32.gmra.mxu2 %v384_v40 }
 0x152   :  { %562 = vmatpush.msra.mxu3 %v549_v51 }
 0x154   :  { %v328_v41 = vpop.f32.mrf.mxu1  ;;  %563 = vmatpush.msra.mxu3 %v548_v52 }
 0x155   :  { %v329_v42 = vadd.f32 %v998_v49, %v328_v41 }
 0x156   :  { %564 = vmatpush.msra.mxu3 %v547_v55 }
 0x157   :  { %v385_v43 = vmax.f32 %v329_v42, 0.0 }
 0x158   :  { %565 = vmatpush.msra.mxu3 %v546_v57 }
 0x159   :  { %464 = vmatmul.f32.gmra.mxu2 %v385_v43 }
 0x15a   :  { %566 = vmatpush.msra.mxu3 %v545_v58 }
 0x15c   :  { %v331_v45 = vpop.f32.mrf.mxu1  ;;  %567 = vmatpush.msra.mxu3 %v544_v59 }
 0x15d   :  { %v332_v46 = vadd.f32 %v998_v49, %v331_v45 }
 0x15e   :  { %568 = vmatpush.msra.mxu3 %v543_v62 }
 0x15f   :  { %v386_v48 = vmax.f32 %v332_v46, 0.0 }
 0x160   :  { %569 = vmatpush.msra.mxu3 %v542_v0 }
 0x161   :  { %467 = vmatmul.f32.gmra.mxu2 %v386_v48 }
 0x162   :  { %570 = vmatpush.msra.mxu3 %v541_v1 }
 0x164   :  { %v334_v53 = vpop.f32.mrf.mxu1  ;;  %571 = vmatpush.msra.mxu3 %v540_v2 }
 0x165   :  { %v335_v54 = vadd.f32 %v998_v49, %v334_v53 }
 0x166   :  { %572 = vmatpush.msra.mxu3 %v539_v5 }
 0x167   :  { %v387_v56 = vmax.f32 %v335_v54, 0.0 }
 0x168   :  { %573 = vmatpush.msra.mxu3 %v538_v7 }
 0x169   :  { %470 = vmatmul.f32.gmra.mxu2 %v387_v56 }
 0x16c   :  { %v337_v60 = vpop.f32.mrf.mxu1 }
 0x16d   :  { %v338_v61 = vadd.f32 %v998_v49, %v337_v60 }
 0x16f   :  { %v388_v63 = vmax.f32 %v338_v61, 0.0 }
 0x171   :  { %473 = vmatmul.f32.gmra.mxu2 %v388_v63 }
 0x174   :  { %v340_v3 = vpop.f32.mrf.mxu1 }
 0x175   :  { %v341_v4 = vadd.f32 %v998_v49, %v340_v3 }
 0x177   :  { %v389_v6 = vmax.f32 %v341_v4, 0.0 }
 0x179   :  { %476 = vmatmul.f32.gmra.mxu2 %v389_v6 }
 0x17c   :  { %v343_v8 = vpop.f32.mrf.mxu1 }
 0x17d   :  { %v344_v9 = vadd.f32 %v998_v49, %v343_v8 }
 0x17f   :  { %v390_v10 = vmax.f32 %v344_v9, 0.0 }
 0x181   :  { %479 = vmatmul.f32.gmra.mxu2 %v390_v10 }
 0x184   :  { %v346_v11 = vpop.f32.mrf.mxu1 }
 0x185   :  { %v347_v12 = vadd.f32 %v998_v49, %v346_v11 }
 0x187   :  { %v391_v13 = vmax.f32 %v347_v12, 0.0 }
 0x189   :  { %482 = vmatmul.f32.gmra.mxu2 %v391_v13 }
 0x18c   :  { %v349_v14 = vpop.f32.mrf.mxu1 }
 0x18d   :  { %v350_v15 = vadd.f32 %v998_v49, %v349_v14 }
 0x18f   :  { %v392_v16 = vmax.f32 %v350_v15, 0.0 }
 0x191   :  { %485 = vmatmul.f32.gmra.mxu2 %v392_v16 }
 0x194   :  { %v352_v18 = vpop.f32.mrf.mxu1  ;;  %v438_v19 = vpop.f32.mrf.mxu2 }
 0x195   :  { %v353_v20 = vadd.f32 %v998_v49, %v352_v18  ;;  %v439_v21 = vadd.f32 %v1077_v17, %v438_v19 }
 0x197   :  { %v393_v22 = vmax.f32 %v353_v20, 0.0  ;;  %v513_v23 = vmax.f32 %v439_v21, 0.0 }
 0x199   :  { %488 = vmatmul.f32.gmra.mxu2 %v393_v22  ;;  %574 = vmatmul.f32.vlgmr.msra.gmra.mxu3 %v513_v23 }
 0x19c   :  { %v355_v24 = vpop.f32.mrf.mxu1  ;;  %v441_v25 = vpop.f32.mrf.mxu2 }
 0x19d   :  { %v356_v26 = vadd.f32 %v998_v49, %v355_v24  ;;  %v442_v27 = vadd.f32 %v1077_v17, %v441_v25 }
 0x19f   :  { %v394_v28 = vmax.f32 %v356_v26, 0.0  ;;  %v514_v29 = vmax.f32 %v442_v27, 0.0 }
 0x1a1   :  { %491 = vmatmul.f32.gmra.mxu2 %v394_v28  ;;  %577 = vmatmul.f32.gmra.mxu3 %v514_v29 }
 0x1a4   :  { %v358_v30 = vpop.f32.mrf.mxu1  ;;  %v444_v31 = vpop.f32.mrf.mxu2 }
 0x1a5   :  { %v359_v32 = vadd.f32 %v998_v49, %v358_v30  ;;  %v445_v33 = vadd.f32 %v1077_v17, %v444_v31  ;;  %v1107_v30 = vld [vmem:[%s1250_s8] ss:$0 sm:$0xff] }
 0x1a7   :  { %v395_v34 = vmax.f32 %v359_v32, 0.0  ;;  %v515_v35 = vmax.f32 %v445_v33, 0.0 }
 0x1a9   :  { %494 = vmatmul.f32.gmra.mxu2 %v395_v34  ;;  %580 = vmatmul.f32.gmra.mxu3 %v515_v35 }
 0x1ac   :  { %v361_v36 = vpop.f32.mrf.mxu1  ;;  %v447_v37 = vpop.f32.mrf.mxu2 }
 0x1ad   :  { %v362_v39 = vadd.f32 %v998_v49, %v361_v36  ;;  %v448_v40 = vadd.f32 %v1077_v17, %v447_v37 }
 0x1af   :  { %v396_v41 = vmax.f32 %v362_v39, 0.0  ;;  %v516_v42 = vmax.f32 %v448_v40, 0.0 }
 0x1b1   :  { %497 = vmatmul.f32.gmra.mxu2 %v396_v41  ;;  %583 = vmatmul.f32.gmra.mxu3 %v516_v42 }
 0x1b4   :  { %v364_v43 = vpop.f32.mrf.mxu1  ;;  %v450_v44 = vpop.f32.mrf.mxu2 }
 0x1b5   :  { %v365_v38 = vadd.f32 %v998_v49, %v364_v43  ;;  %v451_v45 = vadd.f32 %v1077_v17, %v450_v44 }
 0x1b7   :  { %v397_v46 = vmax.f32 %v365_v38, 0.0  ;;  %v517_v47 = vmax.f32 %v451_v45, 0.0 }
 0x1b9   :  { %500 = vmatmul.f32.gmra.mxu2 %v397_v46  ;;  %586 = vmatmul.f32.gmra.mxu3 %v517_v47 }
 0x1bc   :  { %v367_v48 = vpop.f32.mrf.mxu1  ;;  %v453_v50 = vpop.f32.mrf.mxu2 }
 0x1bd   :  { %v368_v51 = vadd.f32 %v998_v49, %v367_v48  ;;  %v454_v52 = vadd.f32 %v1077_v17, %v453_v50 }
 0x1bf   :  { %v398_v53 = vmax.f32 %v368_v51, 0.0  ;;  %v518_v54 = vmax.f32 %v454_v52, 0.0 }
 0x1c1   :  { %503 = vmatmul.f32.gmra.mxu2 %v398_v53  ;;  %589 = vmatmul.f32.gmra.mxu3 %v518_v54 }
 0x1c4   :  { %v370_v55 = vpop.f32.mrf.mxu1  ;;  %v456_v56 = vpop.f32.mrf.mxu2 }
 0x1c5   :  { %v371_v57 = vadd.f32 %v998_v49, %v370_v55  ;;  %v457_v58 = vadd.f32 %v1077_v17, %v456_v56 }
 0x1c7   :  { %v399_v59 = vmax.f32 %v371_v57, 0.0  ;;  %v519_v60 = vmax.f32 %v457_v58, 0.0 }
 0x1c9   :  { %506 = vmatmul.f32.gmra.mxu2 %v399_v59  ;;  %592 = vmatmul.f32.gmra.mxu3 %v519_v60 }
 0x1cc   :  { %v373_v61 = vpop.f32.mrf.mxu1  ;;  %v459_v62 = vpop.f32.mrf.mxu2 }
 0x1cd   :  { %v374_v63 = vadd.f32 %v998_v49, %v373_v61  ;;  %v460_v0 = vadd.f32 %v1077_v17, %v459_v62 }
 0x1cf   :  { %v400_v1 = vmax.f32 %v374_v63, 0.0  ;;  %v520_v2 = vmax.f32 %v460_v0, 0.0 }
 0x1d1   :  { %509 = vmatmul.f32.gmra.mxu2 %v400_v1  ;;  %595 = vmatmul.f32.gmra.mxu3 %v520_v2 }
 0x1d4   :  { %v462_v3 = vpop.f32.mrf.mxu2 }
 0x1d5   :  { %v463_v4 = vadd.f32 %v1077_v17, %v462_v3 }
 0x1d7   :  { %v521_v5 = vmax.f32 %v463_v4, 0.0 }
 0x1d9   :  { %598 = vmatmul.f32.gmra.mxu3 %v521_v5 }
 0x1dc   :  { %v465_v6 = vpop.f32.mrf.mxu2 }
 0x1dd   :  { %v466_v7 = vadd.f32 %v1077_v17, %v465_v6 }
 0x1df   :  { %v522_v8 = vmax.f32 %v466_v7, 0.0 }
 0x1e1   :  { %601 = vmatmul.f32.gmra.mxu3 %v522_v8 }
 0x1e4   :  { %v468_v9 = vpop.f32.mrf.mxu2 }
 0x1e5   :  { %v469_v10 = vadd.f32 %v1077_v17, %v468_v9 }
 0x1e7   :  { %v523_v49 = vmax.f32 %v469_v10, 0.0 }
 0x1e9   :  { %604 = vmatmul.f32.gmra.mxu3 %v523_v49 }
 0x1ec   :  { %v471_v11 = vpop.f32.mrf.mxu2 }
 0x1ed   :  { %v472_v12 = vadd.f32 %v1077_v17, %v471_v11 }
 0x1ef   :  { %v524_v13 = vmax.f32 %v472_v12, 0.0 }
 0x1f1   :  { %607 = vmatmul.f32.gmra.mxu3 %v524_v13 }
 0x1f4   :  { %v474_v14 = vpop.f32.mrf.mxu2 }
 0x1f5   :  { %v475_v15 = vadd.f32 %v1077_v17, %v474_v14 }
 0x1f7   :  { %v525_v16 = vmax.f32 %v475_v15, 0.0 }
 0x1f9   :  { %610 = vmatmul.f32.gmra.mxu3 %v525_v16 }
 0x1fc   :  { %v477_v18 = vpop.f32.mrf.mxu2 }
 0x1fd   :  { %v478_v19 = vadd.f32 %v1077_v17, %v477_v18 }
 0x1ff   :  { %v526_v20 = vmax.f32 %v478_v19, 0.0 }
 0x201   :  { %613 = vmatmul.f32.gmra.mxu3 %v526_v20 }
 0x204   :  { %v480_v21 = vpop.f32.mrf.mxu2 }
 0x205   :  { %v481_v22 = vadd.f32 %v1077_v17, %v480_v21 }
 0x207   :  { %v527_v23 = vmax.f32 %v481_v22, 0.0 }
 0x209   :  { %616 = vmatmul.f32.gmra.mxu3 %v527_v23 }
 0x20c   :  { %v483_v24 = vpop.f32.mrf.mxu2 }
 0x20d   :  { %v484_v25 = vadd.f32 %v1077_v17, %v483_v24 }
 0x20f   :  { %v528_v26 = vmax.f32 %v484_v25, 0.0 }
 0x211   :  { %619 = vmatmul.f32.gmra.mxu3 %v528_v26 }
 0x214   :  { %v486_v27 = vpop.f32.mrf.mxu2 }
 0x215   :  { %v487_v28 = vadd.f32 %v1077_v17, %v486_v27 }
 0x217   :  { %v529_v29 = vmax.f32 %v487_v28, 0.0 }
 0x219   :  { %622 = vmatmul.f32.gmra.mxu3 %v529_v29 }
 0x21c   :  { %v489_v31 = vpop.f32.mrf.mxu2  ;;  %v575_v32 = vpop.f32.mrf.mxu3 }
 0x21d   :  { %v490_v33 = vadd.f32 %v1077_v17, %v489_v31  ;;  %v576_v34 = vadd.f32 %v1107_v30, %v575_v32 }
 0x21f   :  { %v530_v35 = vmax.f32 %v490_v33, 0.0  ;;  %651 = vst.msk [vmem:[%s1251_s9] sm:$0xff] %vm650_vm2, %v576_v34 }
 0x221   :  { %625 = vmatmul.f32.gmra.mxu3 %v530_v35 }
 0x224   :  { %v492_v36 = vpop.f32.mrf.mxu2  ;;  %v578_v37 = vpop.f32.mrf.mxu3 }
 0x225   :  { %v493_v39 = vadd.f32 %v1077_v17, %v492_v36  ;;  %v579_v40 = vadd.f32 %v1107_v30, %v578_v37 }
 0x227   :  { %v531_v41 = vmax.f32 %v493_v39, 0.0  ;;  %652 = vst.msk [vmem:[%s1251_s9 + $0x8] sm:$0xff] %vm650_vm2, %v579_v40 }
 0x229   :  { %628 = vmatmul.f32.gmra.mxu3 %v531_v41 }
 0x22c   :  { %v495_v42 = vpop.f32.mrf.mxu2  ;;  %v581_v43 = vpop.f32.mrf.mxu3 }
 0x22d   :  { %v496_v44 = vadd.f32 %v1077_v17, %v495_v42  ;;  %v582_v38 = vadd.f32 %v1107_v30, %v581_v43 }
 0x22f   :  { %v532_v45 = vmax.f32 %v496_v44, 0.0  ;;  %653 = vst.msk [vmem:[%s1251_s9 + $0x10] sm:$0xff] %vm650_vm2, %v582_v38 }
 0x231   :  { %631 = vmatmul.f32.gmra.mxu3 %v532_v45 }
 0x234   :  { %v498_v46 = vpop.f32.mrf.mxu2  ;;  %v584_v47 = vpop.f32.mrf.mxu3 }
 0x235   :  { %v499_v48 = vadd.f32 %v1077_v17, %v498_v46  ;;  %v585_v50 = vadd.f32 %v1107_v30, %v584_v47 }
 0x237   :  { %v533_v51 = vmax.f32 %v499_v48, 0.0  ;;  %654 = vst.msk [vmem:[%s1251_s9 + $0x18] sm:$0xff] %vm650_vm2, %v585_v50 }
 0x239   :  { %634 = vmatmul.f32.gmra.mxu3 %v533_v51 }
 0x23c   :  { %v501_v52 = vpop.f32.mrf.mxu2  ;;  %v587_v53 = vpop.f32.mrf.mxu3 }
 0x23d   :  { %v502_v54 = vadd.f32 %v1077_v17, %v501_v52  ;;  %v588_v55 = vadd.f32 %v1107_v30, %v587_v53 }
 0x23f   :  { %v534_v56 = vmax.f32 %v502_v54, 0.0  ;;  %655 = vst.msk [vmem:[%s1251_s9 + $0x20] sm:$0xff] %vm650_vm2, %v588_v55 }
 0x241   :  { %637 = vmatmul.f32.gmra.mxu3 %v534_v56 }
 0x244   :  { %v504_v57 = vpop.f32.mrf.mxu2  ;;  %v590_v58 = vpop.f32.mrf.mxu3 }
 0x245   :  { %v505_v59 = vadd.f32 %v1077_v17, %v504_v57  ;;  %v591_v60 = vadd.f32 %v1107_v30, %v590_v58 }
 0x247   :  { %v535_v61 = vmax.f32 %v505_v59, 0.0  ;;  %656 = vst.msk [vmem:[%s1251_s9 + $0x28] sm:$0xff] %vm650_vm2, %v591_v60 }
 0x249   :  { %640 = vmatmul.f32.gmra.mxu3 %v535_v61 }
 0x24c   :  { %v507_v62 = vpop.f32.mrf.mxu2  ;;  %v593_v63 = vpop.f32.mrf.mxu3 }
 0x24d   :  { %v508_v0 = vadd.f32 %v1077_v17, %v507_v62  ;;  %v594_v1 = vadd.f32 %v1107_v30, %v593_v63 }
 0x24f   :  { %v536_v2 = vmax.f32 %v508_v0, 0.0  ;;  %657 = vst.msk [vmem:[%s1251_s9 + $0x30] sm:$0xff] %vm650_vm2, %v594_v1 }
 0x251   :  { %643 = vmatmul.f32.gmra.mxu3 %v536_v2 }
 0x254   :  { %v510_v3 = vpop.f32.mrf.mxu2  ;;  %v596_v4 = vpop.f32.mrf.mxu3 }
 0x255   :  { %v511_v5 = vadd.f32 %v1077_v17, %v510_v3  ;;  %v597_v6 = vadd.f32 %v1107_v30, %v596_v4 }
 0x257   :  { %v537_v7 = vmax.f32 %v511_v5, 0.0  ;;  %658 = vst.msk [vmem:[%s1251_s9 + $0x38] sm:$0xff] %vm650_vm2, %v597_v6 }
 0x259   :  { %646 = vmatmul.f32.gmra.mxu3 %v537_v7 }
 0x25c   :  { %v599_v8 = vpop.f32.mrf.mxu3 }
 0x25d   :  { %v600_v9 = vadd.f32 %v1107_v30, %v599_v8 }
 0x25f   :  { %659 = vst.msk [vmem:[%s1251_s9 + $0x40] sm:$0xff] %vm650_vm2, %v600_v9 }
 0x264   :  { %v602_v10 = vpop.f32.mrf.mxu3 }
 0x265   :  { %v603_v17 = vadd.f32 %v1107_v30, %v602_v10 }
 0x267   :  { %660 = vst.msk [vmem:[%s1251_s9 + $0x48] sm:$0xff] %vm650_vm2, %v603_v17 }
 0x26c   :  { %v605_v49 = vpop.f32.mrf.mxu3 }
 0x26d   :  { %v606_v11 = vadd.f32 %v1107_v30, %v605_v49 }
 0x26f   :  { %661 = vst.msk [vmem:[%s1251_s9 + $0x50] sm:$0xff] %vm650_vm2, %v606_v11 }
 0x274   :  { %v608_v12 = vpop.f32.mrf.mxu3 }
 0x275   :  { %v609_v13 = vadd.f32 %v1107_v30, %v608_v12 }
 0x277   :  { %662 = vst.msk [vmem:[%s1251_s9 + $0x58] sm:$0xff] %vm650_vm2, %v609_v13 }
 0x27c   :  { %v611_v14 = vpop.f32.mrf.mxu3 }
 0x27d   :  { %v612_v15 = vadd.f32 %v1107_v30, %v611_v14 }
 0x27f   :  { %663 = vst.msk [vmem:[%s1251_s9 + $0x60] sm:$0xff] %vm650_vm2, %v612_v15 }
 0x284   :  { %v614_v16 = vpop.f32.mrf.mxu3 }
 0x285   :  { %v615_v18 = vadd.f32 %v1107_v30, %v614_v16 }
 0x287   :  { %664 = vst.msk [vmem:[%s1251_s9 + $0x68] sm:$0xff] %vm650_vm2, %v615_v18 }
 0x28c   :  { %v617_v19 = vpop.f32.mrf.mxu3 }
 0x28d   :  { %v618_v20 = vadd.f32 %v1107_v30, %v617_v19 }
 0x28f   :  { %665 = vst.msk [vmem:[%s1251_s9 + $0x70] sm:$0xff] %vm650_vm2, %v618_v20 }
 0x294   :  { %v620_v21 = vpop.f32.mrf.mxu3 }
 0x295   :  { %v621_v22 = vadd.f32 %v1107_v30, %v620_v21 }
 0x297   :  { %666 = vst.msk [vmem:[%s1251_s9 + $0x78] sm:$0xff] %vm650_vm2, %v621_v22 }
 0x29c   :  { %v623_v23 = vpop.f32.mrf.mxu3 }
 0x29d   :  { %v624_v24 = vadd.f32 %v1107_v30, %v623_v23 }
 0x29f   :  { %667 = vst.msk [vmem:[%s1251_s9 + $0x80] sm:$0xff] %vm650_vm2, %v624_v24 }
 0x2a4   :  { %v626_v25 = vpop.f32.mrf.mxu3 }
 0x2a5   :  { %v627_v26 = vadd.f32 %v1107_v30, %v626_v25 }
 0x2a7   :  { %668 = vst.msk [vmem:[%s1251_s9 + $0x88] sm:$0xff] %vm650_vm2, %v627_v26 }
 0x2ac   :  { %v629_v27 = vpop.f32.mrf.mxu3 }
 0x2ad   :  { %v630_v28 = vadd.f32 %v1107_v30, %v629_v27 }
 0x2af   :  { %669 = vst.msk [vmem:[%s1251_s9 + $0x90] sm:$0xff] %vm650_vm2, %v630_v28 }
 0x2b4   :  { %v632_v29 = vpop.f32.mrf.mxu3 }
 0x2b5   :  { %v633_v31 = vadd.f32 %v1107_v30, %v632_v29 }
 0x2b7   :  { %670 = vst.msk [vmem:[%s1251_s9 + $0x98] sm:$0xff] %vm650_vm2, %v633_v31 }
 0x2bc   :  { %v635_v32 = vpop.f32.mrf.mxu3 }
 0x2bd   :  { %v636_v33 = vadd.f32 %v1107_v30, %v635_v32 }
 0x2bf   :  { %671 = vst.msk [vmem:[%s1251_s9 + $0xa0] sm:$0xff] %vm650_vm2, %v636_v33 }
 0x2c4   :  { %v638_v34 = vpop.f32.mrf.mxu3 }
 0x2c5   :  { %v639_v35 = vadd.f32 %v1107_v30, %v638_v34 }
 0x2c7   :  { %672 = vst.msk [vmem:[%s1251_s9 + $0xa8] sm:$0xff] %vm650_vm2, %v639_v35 }
 0x2cc   :  { %v641_v36 = vpop.f32.mrf.mxu3 }
 0x2cd   :  { %v642_v37 = vadd.f32 %v1107_v30, %v641_v36 }
 0x2cf   :  { %673 = vst.msk [vmem:[%s1251_s9 + $0xb0] sm:$0xff] %vm650_vm2, %v642_v37 }
 0x2d4   :  { %v644_v39 = vpop.f32.mrf.mxu3 }
 0x2d5   :  { %v645_v40 = vadd.f32 %v1107_v30, %v644_v39 }
 0x2d7   :  { %674 = vst.msk [vmem:[%s1251_s9 + $0xb8] sm:$0xff] %vm650_vm2, %v645_v40 }
 0x2dc   :  { %v647_v41 = vpop.f32.mrf.mxu3 }
 0x2dd   :  { %v648_v42 = vadd.f32 %v1107_v30, %v647_v41 }
 0x2df   :  { %675 = vst.msk [vmem:[%s1251_s9 + $0xc0] sm:$0xff] %vm650_vm2, %v648_v42 }

</bundles_post_ra>
